<compile_context>
chip_gen: v7x
topology: tpu7x:2x2x1
jax: 0.10.0
libtpu: 0.0.40
codegen_flags: <defaults>
</compile_context>

<pallas_src>
import jax
import jax.numpy as jnp
from jax.experimental import pallas as pl
from jax.experimental.pallas import tpu as pltpu

_OUT_PAD = 128  # lane-dense output width (num_actions columns are valid)


def _round_up(n, m):
    return ((n + m - 1) // m) * m


def qnet_kernel(x_ref, w1_ref, b1_ref, w2_ref, b2_ref,
                w3_ref, b3_ref, w4_ref, b4_ref, o_ref):
    x = x_ref[...]                       # (TB, 4)   f32
    w1 = w1_ref[...]                     # (4, 128)  f32

    # fc1: K=4 contraction as 4 VPU broadcast-FMAs (MXU would be <2% utilized).
    h = (b1_ref[...]
         + x[:, 0:1] * w1[0:1, :]
         + x[:, 1:2] * w1[1:2, :]
         + x[:, 2:3] * w1[2:3, :]
         + x[:, 3:4] * w1[3:4, :])       # (TB, 128) f32
    h = jnp.tanh(h)

    # fc2 / fc3 / fc4: bf16 MXU operands, f32 accumulation, f32 elementwise.
    h = jnp.tanh(
        jnp.dot(h.astype(jnp.bfloat16), w2_ref[...],
                preferred_element_type=jnp.float32) + b2_ref[...])
    h = jnp.tanh(
        jnp.dot(h.astype(jnp.bfloat16), w3_ref[...],
                preferred_element_type=jnp.float32) + b3_ref[...])
    out = (jnp.dot(h.astype(jnp.bfloat16), w4_ref[...],
                   preferred_element_type=jnp.float32) + b4_ref[...])
    o_ref[...] = out.astype(o_ref.dtype)  # (TB, 128) lane-dense store


def qnetwork_forward(x, params, *, block_b=256):
    """x: (B, 4) float32. params: list of (W(in,out) f32, b(1,out) f32)."""
    B, F = x.shape
    assert F == 4, F
    (w1, b1), (w2, b2), (w3, b3), (w4, b4) = params
    num_actions = w4.shape[1]

    # Pad the final layer out to a lane-dense width (extra columns are zero).
    w4p = jnp.pad(w4, ((0, 0), (0, _OUT_PAD - num_actions)))
    b4p = jnp.pad(b4, ((0, 0), (0, _OUT_PAD - num_actions)))

    # bf16 MXU operands (cast once in the wrapper; biases stay f32).
    w2b = w2.astype(jnp.bfloat16)
    w3b = w3.astype(jnp.bfloat16)
    w4b = w4p.astype(jnp.bfloat16)

    # Batch block: multiple of 8 sublanes, capped at block_b; pad B up to it.
    tb = min(block_b, _round_up(B, 8))
    num_blocks = pl.cdiv(B, tb)
    b_pad = num_blocks * tb
    x_pad = jnp.pad(x, ((0, b_pad - B), (0, 0))) if b_pad != B else x

    def full(arr):
        # Whole array, resident across the batch grid (block index fixed at 0,0).
        return pl.BlockSpec(arr.shape, lambda i: (0, 0))

    out = pl.pallas_call(
        qnet_kernel,
        out_shape=jax.ShapeDtypeStruct((b_pad, _OUT_PAD), jnp.float32),
        grid=(num_blocks,),
        in_specs=[
            pl.BlockSpec((tb, 4), lambda i: (i, 0)),   # x tile
            full(w1), full(b1),
            full(w2b), full(b2),
            full(w3b), full(b3),
            full(w4b), full(b4p),
        ],
        out_specs=pl.BlockSpec((tb, _OUT_PAD), lambda i: (i, 0)),
        compiler_params=pltpu.CompilerParams(
            dimension_semantics=("parallel",)),
    )(x_pad, w1, b1, w2b, b2, w3b, b3, w4b, b4p)

    return out[:B, :num_actions]


def init_params(key, num_actions=3):
    """PyTorch-style nn.Linear init; W stored transposed as (in, out)."""
    dims = [(4, 128), (128, 128), (128, 64), (64, num_actions)]
    params = []
    for fan_in, fan_out in dims:
        key, kw, kb = jax.random.split(key, 3)
        bound = 1.0 / (fan_in ** 0.5)
        w = jax.random.uniform(kw, (fan_in, fan_out), jnp.float32, -bound, bound)
        b = jax.random.uniform(kb, (1, fan_out), jnp.float32, -bound, bound)
        params.append((w, b))
    return params


def reference_forward(x, params, *, bf16_matmuls=False):
    """Pure-JAX reference. bf16_matmuls=True emulates the kernel's precision."""
    h = x
    for i, (w, b) in enumerate(params):
        if bf16_matmuls and i > 0:
            h = jnp.dot(h.astype(jnp.bfloat16), w.astype(jnp.bfloat16),
                        preferred_element_type=jnp.float32) + b
        else:
            h = h @ w + b
        if i < len(params) - 1:
            h = jnp.tanh(h)
    return h


if __name__ == "__main__":
    key = jax.random.PRNGKey(0)
    key, kx = jax.random.split(key)

    B = 8  # small batch; pong feature state dim is 4
    x = jax.random.normal(kx, (B, 4), dtype=jnp.float32)
    params = init_params(key, num_actions=3)

    out = qnetwork_forward(x, params)
    out = jax.block_until_ready(out)
    assert out.shape == (B, 3), out.shape

    # Semantics check vs. the f32 PyTorch-equivalent reference. Tolerance is
    # intentionally loose because fc2..fc4 use bf16 MXU operands (f32 accum).
    ref_f32 = reference_forward(x, params)
    err_f32 = jnp.max(jnp.abs(out - ref_f32))
    assert jnp.allclose(out, ref_f32, atol=5e-2, rtol=5e-2), f"f32 ref err {err_f32}"

    # Tight check vs. a reference that emulates the kernel's bf16 matmul precision.
    ref_bf16 = reference_forward(x, params, bf16_matmuls=True)
    err_bf16 = jnp.max(jnp.abs(out - ref_bf16))
    assert jnp.allclose(out, ref_bf16, atol=1e-4, rtol=1e-4), f"bf16 ref err {err_bf16}"

    print("KERNEL_OK")
</pallas_src>

<mosaic_0001>
module attributes {stable_mosaic.version = 11 : i64} {
  func.func @qnet_kernel(%arg0: i32, %arg1: memref<8x4xf32, #tpu.memory_space<vmem>>, %arg2: memref<4x128xf32, #tpu.memory_space<vmem>>, %arg3: memref<1x128xf32, #tpu.memory_space<vmem>>, %arg4: memref<128x128xbf16, #tpu.memory_space<vmem>>, %arg5: memref<1x128xf32, #tpu.memory_space<vmem>>, %arg6: memref<128x64xbf16, #tpu.memory_space<vmem>>, %arg7: memref<1x64xf32, #tpu.memory_space<vmem>>, %arg8: memref<64x128xbf16, #tpu.memory_space<vmem>>, %arg9: memref<1x128xf32, #tpu.memory_space<vmem>>, %arg10: memref<8x128xf32, #tpu.memory_space<vmem>>) attributes {dimension_semantics = [#tpu.dimension_semantics<parallel>], iteration_bounds = array<i64: 1>, scalar_prefetch = 0 : i64, scratch_operands = 0 : i64, tpu.core_type = #tpu.core_type<tc>, window_params = [{transform_indices = @transform_0, window_bounds = array<i64: 8, 4>}, {pipeline_mode = #tpu.pipeline_mode<synchronous>, transform_indices = @transform_1, window_bounds = array<i64: 4, 128>}, {pipeline_mode = #tpu.pipeline_mode<synchronous>, transform_indices = @transform_2, window_bounds = array<i64: 1, 128>}, {pipeline_mode = #tpu.pipeline_mode<synchronous>, transform_indices = @transform_3, window_bounds = array<i64: 128, 128>}, {pipeline_mode = #tpu.pipeline_mode<synchronous>, transform_indices = @transform_4, window_bounds = array<i64: 1, 128>}, {pipeline_mode = #tpu.pipeline_mode<synchronous>, transform_indices = @transform_5, window_bounds = array<i64: 128, 64>}, {pipeline_mode = #tpu.pipeline_mode<synchronous>, transform_indices = @transform_6, window_bounds = array<i64: 1, 64>}, {pipeline_mode = #tpu.pipeline_mode<synchronous>, transform_indices = @transform_7, window_bounds = array<i64: 64, 128>}, {pipeline_mode = #tpu.pipeline_mode<synchronous>, transform_indices = @transform_8, window_bounds = array<i64: 1, 128>}, {transform_indices = @transform_9, window_bounds = array<i64: 8, 128>}]} {
    %c0 = arith.constant 0 : index
    %c0_0 = arith.constant 0 : index
    %0 = vector.load %arg1[%c0, %c0_0] : memref<8x4xf32, #tpu.memory_space<vmem>>, vector<8x4xf32>
    %c0_1 = arith.constant 0 : index
    %c0_2 = arith.constant 0 : index
    %1 = vector.load %arg2[%c0_1, %c0_2] : memref<4x128xf32, #tpu.memory_space<vmem>>, vector<4x128xf32>
    %c0_3 = arith.constant 0 : index
    %c0_4 = arith.constant 0 : index
    %2 = vector.load %arg3[%c0_3, %c0_4] : memref<1x128xf32, #tpu.memory_space<vmem>>, vector<1x128xf32>
    %3 = vector.extract_strided_slice %0 {offsets = [0, 0], sizes = [8, 1], strides = [1, 1]} : vector<8x4xf32> to vector<8x1xf32>
    %4 = vector.extract_strided_slice %1 {offsets = [0, 0], sizes = [1, 128], strides = [1, 1]} : vector<4x128xf32> to vector<1x128xf32>
    %5 = vector.broadcast %3 : vector<8x1xf32> to vector<8x128xf32>
    %6 = vector.broadcast %4 : vector<1x128xf32> to vector<8x128xf32>
    %7 = arith.mulf %5, %6 : vector<8x128xf32>
    %8 = vector.broadcast %2 : vector<1x128xf32> to vector<8x128xf32>
    %9 = arith.addf %8, %7 : vector<8x128xf32>
    %10 = vector.extract_strided_slice %0 {offsets = [0, 1], sizes = [8, 1], strides = [1, 1]} : vector<8x4xf32> to vector<8x1xf32>
    %11 = vector.extract_strided_slice %1 {offsets = [1, 0], sizes = [1, 128], strides = [1, 1]} : vector<4x128xf32> to vector<1x128xf32>
    %12 = vector.broadcast %10 : vector<8x1xf32> to vector<8x128xf32>
    %13 = vector.broadcast %11 : vector<1x128xf32> to vector<8x128xf32>
    %14 = arith.mulf %12, %13 : vector<8x128xf32>
    %15 = arith.addf %9, %14 : vector<8x128xf32>
    %16 = vector.extract_strided_slice %0 {offsets = [0, 2], sizes = [8, 1], strides = [1, 1]} : vector<8x4xf32> to vector<8x1xf32>
    %17 = vector.extract_strided_slice %1 {offsets = [2, 0], sizes = [1, 128], strides = [1, 1]} : vector<4x128xf32> to vector<1x128xf32>
    %18 = vector.broadcast %16 : vector<8x1xf32> to vector<8x128xf32>
    %19 = vector.broadcast %17 : vector<1x128xf32> to vector<8x128xf32>
    %20 = arith.mulf %18, %19 : vector<8x128xf32>
    %21 = arith.addf %15, %20 : vector<8x128xf32>
    %22 = vector.extract_strided_slice %0 {offsets = [0, 3], sizes = [8, 1], strides = [1, 1]} : vector<8x4xf32> to vector<8x1xf32>
    %23 = vector.extract_strided_slice %1 {offsets = [3, 0], sizes = [1, 128], strides = [1, 1]} : vector<4x128xf32> to vector<1x128xf32>
    %24 = vector.broadcast %22 : vector<8x1xf32> to vector<8x128xf32>
    %25 = vector.broadcast %23 : vector<1x128xf32> to vector<8x128xf32>
    %26 = arith.mulf %24, %25 : vector<8x128xf32>
    %27 = arith.addf %21, %26 : vector<8x128xf32>
    %28 = math.tanh %27 : vector<8x128xf32>
    %29 = arith.truncf %28 : vector<8x128xf32> to vector<8x128xbf16>
    %c0_5 = arith.constant 0 : index
    %c0_6 = arith.constant 0 : index
    %30 = vector.load %arg4[%c0_5, %c0_6] : memref<128x128xbf16, #tpu.memory_space<vmem>>, vector<128x128xbf16>
    %cst = arith.constant dense<0.000000e+00> : vector<8x128xf32>
    %31 = tpu.matmul %29, %30, %cst {dimension_numbers = #tpu.dot_dimension_numbers<[1], [0], [0], [1], [0, 0, 1, 1], [], []>} : vector<8x128xbf16>, vector<128x128xbf16>, vector<8x128xf32> -> vector<8x128xf32>
    %c0_7 = arith.constant 0 : index
    %c0_8 = arith.constant 0 : index
    %32 = vector.load %arg5[%c0_7, %c0_8] : memref<1x128xf32, #tpu.memory_space<vmem>>, vector<1x128xf32>
    %33 = vector.broadcast %32 : vector<1x128xf32> to vector<8x128xf32>
    %34 = arith.addf %31, %33 : vector<8x128xf32>
    %35 = math.tanh %34 : vector<8x128xf32>
    %36 = arith.truncf %35 : vector<8x128xf32> to vector<8x128xbf16>
    %c0_9 = arith.constant 0 : index
    %c0_10 = arith.constant 0 : index
    %37 = vector.load %arg6[%c0_9, %c0_10] : memref<128x64xbf16, #tpu.memory_space<vmem>>, vector<128x64xbf16>
    %cst_11 = arith.constant dense<0.000000e+00> : vector<8x64xf32>
    %38 = tpu.matmul %36, %37, %cst_11 {dimension_numbers = #tpu.dot_dimension_numbers<[1], [0], [0], [1], [0, 0, 1, 1], [], []>} : vector<8x128xbf16>, vector<128x64xbf16>, vector<8x64xf32> -> vector<8x64xf32>
    %c0_12 = arith.constant 0 : index
    %c0_13 = arith.constant 0 : index
    %39 = vector.load %arg7[%c0_12, %c0_13] : memref<1x64xf32, #tpu.memory_space<vmem>>, vector<1x64xf32>
    %40 = vector.broadcast %39 : vector<1x64xf32> to vector<8x64xf32>
    %41 = arith.addf %38, %40 : vector<8x64xf32>
    %42 = math.tanh %41 : vector<8x64xf32>
    %43 = arith.truncf %42 : vector<8x64xf32> to vector<8x64xbf16>
    %c0_14 = arith.constant 0 : index
    %c0_15 = arith.constant 0 : index
    %44 = vector.load %arg8[%c0_14, %c0_15] : memref<64x128xbf16, #tpu.memory_space<vmem>>, vector<64x128xbf16>
    %cst_16 = arith.constant dense<0.000000e+00> : vector<8x128xf32>
    %45 = tpu.matmul %43, %44, %cst_16 {dimension_numbers = #tpu.dot_dimension_numbers<[1], [0], [0], [1], [0, 0, 1, 1], [], []>} : vector<8x64xbf16>, vector<64x128xbf16>, vector<8x128xf32> -> vector<8x128xf32>
    %c0_17 = arith.constant 0 : index
    %c0_18 = arith.constant 0 : index
    %46 = vector.load %arg9[%c0_17, %c0_18] : memref<1x128xf32, #tpu.memory_space<vmem>>, vector<1x128xf32>
    %47 = vector.broadcast %46 : vector<1x128xf32> to vector<8x128xf32>
    %48 = arith.addf %45, %47 : vector<8x128xf32>
    %c0_19 = arith.constant 0 : index
    %c0_20 = arith.constant 0 : index
    %49 = vector.load %arg10[%c0_19, %c0_20] : memref<8x128xf32, #tpu.memory_space<vmem>>, vector<8x128xf32>
    tpu.vector_store %arg10[%c0_19, %c0_20], %48 {strides = array<i32>} : memref<8x128xf32, #tpu.memory_space<vmem>>, vector<8x128xf32>,
    return
  }
  func.func @transform_0(%arg0: i32) -> (i32, i32) {
    %c0_i32 = arith.constant 0 : i32
    %c0_i32_0 = arith.constant 0 : i32
    return %arg0, %c0_i32 : i32, i32
  }
  func.func @transform_1(%arg0: i32) -> (i32, i32) {
    %c0_i32 = arith.constant 0 : i32
    %c0_i32_0 = arith.constant 0 : i32
    %c0_i32_1 = arith.constant 0 : i32
    return %c0_i32, %c0_i32_0 : i32, i32
  }
  func.func @transform_2(%arg0: i32) -> (i32, i32) {
    %c0_i32 = arith.constant 0 : i32
    %c0_i32_0 = arith.constant 0 : i32
    %c0_i32_1 = arith.constant 0 : i32
    return %c0_i32, %c0_i32_0 : i32, i32
  }
  func.func @transform_3(%arg0: i32) -> (i32, i32) {
    %c0_i32 = arith.constant 0 : i32
    %c0_i32_0 = arith.constant 0 : i32
    %c0_i32_1 = arith.constant 0 : i32
    return %c0_i32, %c0_i32_0 : i32, i32
  }
  func.func @transform_4(%arg0: i32) -> (i32, i32) {
    %c0_i32 = arith.constant 0 : i32
    %c0_i32_0 = arith.constant 0 : i32
    %c0_i32_1 = arith.constant 0 : i32
    return %c0_i32, %c0_i32_0 : i32, i32
  }
  func.func @transform_5(%arg0: i32) -> (i32, i32) {
    %c0_i32 = arith.constant 0 : i32
    %c0_i32_0 = arith.constant 0 : i32
    %c0_i32_1 = arith.constant 0 : i32
    return %c0_i32, %c0_i32_0 : i32, i32
  }
  func.func @transform_6(%arg0: i32) -> (i32, i32) {
    %c0_i32 = arith.constant 0 : i32
    %c0_i32_0 = arith.constant 0 : i32
    %c0_i32_1 = arith.constant 0 : i32
    return %c0_i32, %c0_i32_0 : i32, i32
  }
  func.func @transform_7(%arg0: i32) -> (i32, i32) {
    %c0_i32 = arith.constant 0 : i32
    %c0_i32_0 = arith.constant 0 : i32
    %c0_i32_1 = arith.constant 0 : i32
    return %c0_i32, %c0_i32_0 : i32, i32
  }
  func.func @transform_8(%arg0: i32) -> (i32, i32) {
    %c0_i32 = arith.constant 0 : i32
    %c0_i32_0 = arith.constant 0 : i32
    %c0_i32_1 = arith.constant 0 : i32
    return %c0_i32, %c0_i32_0 : i32, i32
  }
  func.func @transform_9(%arg0: i32) -> (i32, i32) {
    %c0_i32 = arith.constant 0 : i32
    %c0_i32_0 = arith.constant 0 : i32
    return %arg0, %c0_i32 : i32, i32
  }
}

</mosaic_0001>

<bundles_post_ra>
// kernel: tpu_custom_call.1
= control target key start
LH: loop header
LB: loop body
LE: loop exit
PB: predicated region body
PF: predicated region fallthrough
CT: control target
= control target key end

     0   :  { %v572_v2 = vmov 0   ;;  %v573_v3 = vmov 2   ;;  %v574_v4 = vmov 0.0   ;;  %v575_v6 = vmov 1   ;;  %s745_s0 = inlined_call_operand.vmem [shape: f32[8,4], index: 0, kind: input, shape index: {}]   ;;  %s746_s1 = inlined_call_operand.vmem [shape: f32[4,128], index: 1, kind: input, shape index: {}]   ;;  %s747_s2 = inlined_call_operand.vmem [shape: f32[1,128], index: 2, kind: input, shape index: {}]   ;;  %s748_s3 = inlined_call_operand.vmem [shape: bf16[128,128], index: 3, kind: input, shape index: {}]   ;;  %s749_s4 = inlined_call_operand.vmem [shape: f32[1,128], index: 4, kind: input, shape index: {}]   ;;  %s750_s5 = inlined_call_operand.vmem [shape: bf16[128,64], index: 5, kind: input, shape index: {}]   ;;  %s751_s6 = inlined_call_operand.vmem [shape: f32[1,64], index: 6, kind: input, shape index: {}]   ;;  %s752_s7 = inlined_call_operand.vmem [shape: bf16[64,128], index: 7, kind: input, shape index: {}]   ;;  %s753_s8 = inlined_call_operand.vmem [shape: f32[1,128], index: 8, kind: input, shape index: {}]   ;;  %s754_s9 = inlined_call_operand.hbm [shape: f32[8,128], index: 9, kind: output, shape index: {}]  }
   0x1   :  { %v34_v0 = vld [vmem:[%s745_s0] sm:$0xff]  ;;  %517 = vset.pattern.permute.xlu0 %v572_v2  ;;  %519 = vset.pattern.permute.xlu1 %v573_v3  ;;  %v523_v5 = vld [vmem:[%s748_s3 + $0x8] sm:$0xff]   ;;  %v576_v7 = vmov 3   ;;  %v524_v8 = vld [vmem:[%s748_s3 + $0x10] sm:$0xff]   ;;  %vm577_vm0 = vmmov 0  }
   0x2   :  { %v522_v1 = vld [vmem:[%s748_s3] sm:$0xff]   ;;  %39 = vperm.xlu0 %517, %v34_v0   ;;  %65 = vperm.xlu1 %519, %v34_v0   ;;  %v525_v9 = vld [vmem:[%s748_s3 + $0x18] sm:$0xff]  }
   0x3   :  { %458 = vmatprep.subr.bf16.mxu0 %v574_v4  ;;  %478 = vmatprep.subr.bf16.mxu1 %v574_v4  ;;  %v526_v10 = vld [vmem:[%s748_s3 + $0x20] sm:$0xff]  }
   0x4   :  { %459 = vmatpush3.bf16.msra.mxu0 %v522_v1  ;;  %474 = vmatprep.mubr.msk.bf16.mxu0 %vm577_vm0, %v574_v4 }
   0x5   :  { %460 = vmatprep.subr.bf16.mxu0 %v574_v4  ;;  %494 = vmatprep.mubr.msk.bf16.mxu1 %vm577_vm0, %v574_v4 }
   0x6   :  { %518 = vset.pattern.permute.xlu0 %v575_v6  ;;  %520 = vset.pattern.permute.xlu1 %v576_v7 }
   0x7   :  { %55 = vperm.xlu0 %518, %v34_v0   ;;  %75 = vperm.xlu1 %520, %v34_v0  }
   0x8   :  { %461 = vmatpush3.bf16.msra.mxu0 %v523_v5 }
   0x9   :  { %462 = vmatprep.subr.bf16.mxu0 %v574_v4 }
   0xb   :  { %521 = vset.pattern.permute.xlu0 %v576_v7 }
   0xc   :  { %463 = vmatpush3.bf16.msra.mxu0 %v524_v8 }
   0xd   :  { %464 = vmatprep.subr.bf16.mxu0 %v574_v4 }
  0x10   :  { %465 = vmatpush3.bf16.msra.mxu0 %v525_v9 }
  0x11   :  { %466 = vmatprep.subr.bf16.mxu0 %v574_v4 }
  0x12   :  { %14 = vsyncpa [#allocation3], 0  ;;  %v527_v11 = vld [vmem:[%s748_s3 + $0x28] sm:$0xff]   ;;  %v528_v12 = vld [vmem:[%s748_s3 + $0x30] sm:$0xff]   ;;  %v42_v18 = vlaneseq  ;;  %vm351_vm1 = vcmask 523264  }
  0x13   :  { %v529_v13 = vld [vmem:[%s748_s3 + $0x38] sm:$0xff]   ;;  %v530_v14 = vld [vmem:[%s750_s5] sm:$0xff]   ;;  %v531_v15 = vld [vmem:[%s750_s5 + $0x8] sm:$0xff]  }
  0x14   :  { %467 = vmatpush3.bf16.msra.mxu0 %v526_v10  ;;  %479 = vmatpush3.bf16.msra.mxu1 %v530_v14  ;;  %v532_v16 = vld [vmem:[%s750_s5 + $0x10] sm:$0xff]   ;;  %v533_v17 = vld [vmem:[%s750_s5 + $0x18] sm:$0xff]   ;;  %v43_v19 = vshrl.u32 %v42_v18, 7  ;;  %v35_v21 = vld [vmem:[%s746_s1] sm:$0xf] }
  0x15   :  { %468 = vmatprep.subr.bf16.mxu0 %v574_v4  ;;  %480 = vmatprep.subr.bf16.mxu1 %v574_v4  ;;  %v410_v30 = vld [vmem:[%s747_s2] ss:$0 sm:$0xff]  ;;  %v535_v45 = vld [vmem:[%s750_s5 + $0x28] sm:$0xff]   ;;  %v536_v46 = vld [vmem:[%s750_s5 + $0x30] sm:$0xff]  }
  0x16   :  { %v44_v20 = vsub.s32 0, %v43_v19  ;;  %v60_v23 = vsub.s32 1, %v43_v19  ;;  %v70_v25 = vsub.s32 2, %v43_v19  ;;  %v80_v27 = vsub.s32 3, %v43_v19  ;;  %v534_v44 = vld [vmem:[%s750_s5 + $0x20] sm:$0xff]   ;;  %v537_v47 = vld [vmem:[%s750_s5 + $0x38] sm:$0xff]  }
  0x17   :  { %v411_v48 = vld [vmem:[%s749_s4] ss:$0 sm:$0xff]  ;;  %v539_v57 = vld [vmem:[%s752_s7 + $0x8] sm:$0xff]   ;;  %v540_v58 = vld [vmem:[%s752_s7 + $0x10] sm:$0xff]  }
  0x18   :  { %469 = vmatpush3.bf16.msra.mxu0 %v527_v11  ;;  %481 = vmatpush3.bf16.msra.mxu1 %v531_v15  ;;  %v45_v22 = vrot.slane %v35_v21, %v44_v20  ;;  %v61_v29 = vrot.slane %v35_v21, %v60_v23  ;;  %v71_v31 = vrot.slane %v35_v21, %v70_v25  ;;  %v538_v56 = vld [vmem:[%s752_s7] sm:$0xff]   ;;  %v541_v59 = vld [vmem:[%s752_s7 + $0x18] sm:$0xff]   ;;  %s578_s7 = smov [#allocation2]  }
  0x19   :  { %470 = vmatprep.subr.bf16.mxu0 %v574_v4  ;;  %482 = vmatprep.subr.bf16.mxu1 %v574_v4  ;;  %v81_v32 = vrot.slane %v35_v21, %v80_v27  ;;  %v420_v60 = vld [vmem:[%s751_s6] ss:$0 sm:$0xff]  ;;  %s402_s11 = sshll.u32 %s578_s7, 4  ;;  %s403_s11 = int_to_ptr.vmem [resolvable:$true] %s402_s11 }
  0x1a   :  { %s548_s6 = scalar_lea.vmem %s403_s11, 128  ;;  %p553_p1 = scmp.lt.s32.totalorder %s403_s11, %s403_s11 }
  0x1b   :  { %p549_p0 = scmp.ne.s32.totalorder %s403_s11, %s548_s6  ;;  %p554_p2 = scmp.lt.s32.totalorder %s548_s6, %s548_s6 }
  0x1c   :  { %471 = vmatpush3.bf16.msra.mxu0 %v528_v12  ;;  %483 = vmatpush3.bf16.msra.mxu1 %v532_v16 }
  0x1d   :  { %472 = vmatprep.subr.bf16.mxu0 %v574_v4  ;;  %484 = vmatprep.subr.bf16.mxu1 %v574_v4  ;;  %p555_p3 = por %p554_p2, %p553_p1 }
  0x1f   :  { %p556_p4 = pnand %p555_p3, %p549_p0 }
  0x20   :  { %473 = vmatpush3.bf16.msra.mxu0 %v529_v13  ;;  %485 = vmatpush3.bf16.msra.mxu1 %v533_v17 }
  0x21   :  { %498 = vmatprep.subr.bf16.mxu0 %v574_v4  ;;  %486 = vmatprep.subr.bf16.mxu1 %v574_v4 }
  0x24   :  { %487 = vmatpush3.bf16.msra.mxu1 %v534_v44 }
  0x25   :  { %488 = vmatprep.subr.bf16.mxu1 %v574_v4 }
  0x28   :  { %489 = vmatpush3.bf16.msra.mxu1 %v535_v45 }
  0x29   :  { %490 = vmatprep.subr.bf16.mxu1 %v574_v4 }
  0x2c   :  { %491 = vmatpush3.bf16.msra.mxu1 %v536_v46 }
  0x2d   :  { %492 = vmatprep.subr.bf16.mxu1 %v574_v4 }
  0x30   :  { %493 = vmatpush3.bf16.msra.mxu1 %v537_v47 }
  0x81   :  { %v40_v24 = vpop.permute.xlu0 %39  ;;  %v66_v26 = vpop.permute.xlu1 %65 }
  0x82   :  { %v46_v28 = vmul.f32 %v45_v22, %v40_v24  ;;  %v72_v37 = vmul.f32 %v71_v31, %v66_v26 }
  0x84   :  { %v53_v35 = vadd.f32 %v410_v30, %v46_v28 }
  0x86   :  { %v56_v33 = vpop.permute.xlu0 %55  ;;  %v76_v34 = vpop.permute.xlu1 %75 }
  0x87   :  { %v62_v36 = vmul.f32 %v61_v29, %v56_v33  ;;  %v82_v39 = vmul.f32 %v81_v32, %v76_v34 }
  0x89   :  { %v63_v38 = vadd.f32 %v62_v36, %v53_v35 }
  0x8b   :  { %v73_v40 = vadd.f32 %v72_v37, %v63_v38 }
  0x8d   :  { %v83_v41 = vadd.f32 %v82_v39, %v73_v40 }
  0x8f   :  { %542 = vtanh.f32 %v83_v41 }
  0x99   :  { %v543_v42 = vpop.eup %542 }
  0x9a   :  { %v85_v43 = vpack.c.bf16 %v543_v42, %v543_v42 }
  0x9c   :  { %475 = vmatmul.mubr.bf16.vlgmr.msra.gmra.mrb[0].mxu0 %v85_v43 }
  0x9d   :  { %506 = vmatprep.mubr.msk.bf16.mxu0 %vm577_vm0, %v574_v4  ;;  %499 = vmatpush3.bf16.msra.mxu0 %v538_v56 }
  0x9e   :  { %500 = vmatprep.subr.bf16.mxu0 %v574_v4 }
  0xa1   :  { %501 = vmatpush3.bf16.msra.mxu0 %v539_v57 }
  0xa2   :  { %502 = vmatprep.subr.bf16.mxu0 %v574_v4 }
  0xa5   :  { %503 = vmatpush3.bf16.msra.mxu0 %v540_v58 }
  0xa6   :  { %504 = vmatprep.subr.bf16.mxu0 %v574_v4  ;;  %v429_v4 = vld [vmem:[%s753_s8] ss:$0 sm:$0xff] }
  0xa9   :  { %505 = vmatpush3.bf16.msra.mxu0 %v541_v59 }
 0x16f   :  { %v191_v49 = vpop.f32.mrb[0].mxu0 }
 0x170   :  { %v192_v50 = vadd.f32 %v411_v48, %v191_v49  ;;  %v476_v51 = vpop.f32.mrb[1].mxu0 }
 0x171   :  { %v194_v52 = vpop.f32.mrb[2].mxu0 }
 0x172   :  { %544 = vtanh.f32 %v192_v50  ;;  %v477_v53 = vpop.f32.mrb[3].mxu0 }
 0x17c   :  { %v545_v54 = vpop.eup %544 }
 0x17d   :  { %v198_v55 = vpack.c.bf16 %v545_v54, %v545_v54 }
 0x17f   :  { %495 = vmatmul.mubr.bf16.vlgmr.msra.gmra.mrb[0].mxu1 %v198_v55 }
 0x252   :  { %v304_v61 = vpop.f32.mrb[0].mxu1 }
 0x253   :  { %v305_v62 = vadd.f32 %v420_v60, %v304_v61  ;;  %v496_v63 = vpop.f32.mrb[1].mxu1 }
 0x254   :  { %v307_v0 = vpop.f32.mrb[2].mxu1 }
 0x255   :  { %546 = vtanh.f32 %v305_v62  ;;  %v497_v1 = vpop.f32.mrb[3].mxu1 }
 0x25f   :  { %v547_v2 = vpop.eup %546 }
 0x260   :  { %v311_v3 = vpack.c.bf16 %v547_v2, %v547_v2 }
 0x262   :  { %507 = vmatmul.mubr.msk.bf16.vlgmr.msra.gmra.mrb[4].mxu0 %vm351_vm1, %v311_v3 }
 0x335   :  { %v389_v5 = vpop.f32.mrb[4].mxu0 }
 0x336   :  { %v390_v6 = vadd.f32 %v429_v4, %v389_v5  ;;  %v508_v7 = vpop.f32.mrb[5].mxu0 }
 0x337   :  { %v392_v8 = vpop.f32.mrb[6].mxu0 }
 0x338   :  { %395 = vst [vmem:[#allocation2] sm:$0xff] %v390_v6  ;;  %v509_v9 = vpop.f32.mrb[7].mxu0 }
 0x339   :  { %559 = shalt.err (!%p556_p4)
}
 0x33a   :  { %s560_s8 = scalar_lea.hbm %s754_s9, 128 }
 0x33b   :  { %p561_p5 = scmp.ne.s32.totalorder %s754_s9, %s560_s8  ;;  %p564_p6 = scmp.lt.u32.totalorder %s560_s8, %s754_s9 }
 0x33d   :  { %p566_p7 = pnand %p564_p6, %p561_p5 }
 0x33f   :  { %569 = shalt.err (!%p566_p7)
}
 0x340   :  { %405 = dma.vmem_to_hbm [thread:$0]  %s403_s11, 128, %s754_s9, [#allocation3]  }
 0x341   :  { %570 = dma.done.wait [#allocation3], 128  }
 0x342   :  { %571 = vsyncadd [#allocation3], 4294967168 }
 0x343   :  { %409 = vsyncpa [#allocation3], 1 }

</bundles_post_ra>
